<compile_context>
chip_gen: v6e
topology: v6e:2x2x1
jax: 0.10.0
libtpu: 0.0.40
codegen_flags: <defaults>
</compile_context>

<pallas_src>
from functools import partial

import jax
import jax.numpy as jnp
from jax.experimental import pallas as pl
from jax.experimental.pallas import tpu as pltpu

IN_FEATURES = 13
HIDDEN = 10
OUT_FEATURES = 1

# ~6.8 MB of x per grid step.  v5e already saturates around 65536; 131072 is
# the v6e/v7x sweet spot and is harmless on v5e (VMEM limit is raised below).
DEFAULT_BLOCK_B = 131072


def _cdiv(a, b):
    return -(-a // b)


def _round_up(n, m):
    return ((n + m - 1) // m) * m


def _pick_tile(batch, cap):
    """Adaptive batch tile: bounds padding waste, keeps >=2 grid steps."""
    cap = max(128, _round_up(int(cap), 128))
    n = _cdiv(batch, cap)
    if n == 1 and batch > 128:
        n = 2                       # keep both v7x TensorCores busy
    tb = _round_up(_cdiv(batch, n), 128)
    steps = _cdiv(batch, tb)
    return tb, steps


def _mlp_kernel(xT_ref, w1_ref, b1_ref, w2_ref, b2_ref, o_ref):
    # xT_ref: [13, TB]   (batch on lanes)
    # w1_ref: [10, 13]   (torch layout: [out, in])
    # b1_ref: [10, 1]
    # w2_ref: [10, 1]    (torch layer2 weight as a column)
    # b2_ref: [1, 1]
    # o_ref : [1, TB]
    xT = xT_ref[...]
    # Layer 1 on the MXU: [10, 13] x [13, TB] -> [10, TB], f32 accumulation.
    h = jnp.dot(w1_ref[...], xT, preferred_element_type=jnp.float32)
    h = jnp.maximum(h + b1_ref[...], 0.0)                   # bias + ReLU (VPU)
    # Layer 2 (single output feature): VPU mul + cross-sublane reduce -> [1, TB].
    y = jnp.sum(h * w2_ref[...], axis=0, keepdims=True) + b2_ref[...]
    o_ref[...] = y.astype(o_ref.dtype)


def _forward_row(xT, w1, b1, w2, b2, block_b):
    """Core pallas_call.  xT: [13, B] feature-major.  Returns a [1, B] row."""
    batch = xT.shape[1]

    # For batch >= 128 the ragged final block is clipped by Pallas -> no
    # padding pass.  Only tiny batches (< one 128-lane tile) get padded.
    if batch < 128:
        xT = jnp.pad(xT, ((0, 0), (0, 128 - batch)))
    b_lanes = xT.shape[1]

    tb, steps = _pick_tile(b_lanes, block_b)

    b1_col = b1.reshape(HIDDEN, 1)
    w2_col = w2.reshape(HIDDEN, 1)
    b2_11 = b2.reshape(1, 1)

    # ~192 B of VMEM per batch row of tile: 2x double-buffered [13,TB] input
    # (padded to 16 sublanes = 64*TB each) + 2x [1,TB] output (32*TB each),
    # plus headroom for the resident weights.
    vmem_limit = max(32 << 20, 192 * tb + (2 << 20))

    out_row = pl.pallas_call(
        _mlp_kernel,
        out_shape=jax.ShapeDtypeStruct((1, b_lanes), jnp.float32),
        grid_spec=pltpu.PrefetchScalarGridSpec(
            num_scalar_prefetch=0,
            grid=(steps,),
            in_specs=[
                # x^T streams with the batch grid index (double-buffered).
                pl.BlockSpec((IN_FEATURES, tb), lambda i: (0, i)),
                # Parameters: constant block index -> fetched once, resident.
                pl.BlockSpec((HIDDEN, IN_FEATURES), lambda i: (0, 0)),
                pl.BlockSpec((HIDDEN, 1), lambda i: (0, 0)),
                pl.BlockSpec((HIDDEN, 1), lambda i: (0, 0)),
                pl.BlockSpec((1, 1), lambda i: (0, 0)),
            ],
            # Lane-dense output row, keyed by the batch grid index.
            out_specs=pl.BlockSpec((1, tb), lambda i: (0, i)),
        ),
        compiler_params=pltpu.CompilerParams(
            dimension_semantics=("parallel",),  # shards batch across v7x TCs
            vmem_limit_bytes=int(vmem_limit),
        ),
    )(xT, w1, b1_col, w2_col, b2_11)

    if b_lanes != batch:
        out_row = out_row[:, :batch]
    return out_row


@partial(jax.jit, static_argnames=("block_b",))
def nonlinear_forward_feature_major(xT, w1, b1, w2, b2, *,
                                    block_b=DEFAULT_BLOCK_B):
    """Fast path: x already feature-major [13, B].  Returns a [1, B] row.

    Zero wrapper relayout -> the kernel's 52+4 B/row is the only HBM traffic.
    """
    return _forward_row(xT, w1, b1, w2, b2, block_b)


@partial(jax.jit, static_argnames=("block_b",))
def nonlinear_forward(x, w1, b1, w2, b2, *, block_b=DEFAULT_BLOCK_B):
    """Torch-compatible forward.

    x  : [B, 13] f32
    w1 : [10, 13] f32   (torch nn.Linear(13,10).weight layout)
    b1 : [10]     f32
    w2 : [10]     f32   (torch nn.Linear(10,1).weight squeezed)
    b2 : [1]      f32
    returns [B, 1] f32
    """
    batch = x.shape[0]
    # Layout plumbing outside the kernel: one XLA transpose pass over x.  If
    # the producer can emit x feature-major [13, B], call
    # nonlinear_forward_feature_major instead and skip this pass entirely.
    xT = jnp.transpose(x)
    out_row = _forward_row(xT, w1, b1, w2, b2, block_b)
    # Back to the torch layout [B, 1].  (Consumers that accept the raw [1, B]
    # row should use the feature-major entry point to skip this reshape too.)
    return out_row.reshape(batch, OUT_FEATURES)


def init_params(key):
    """torch.nn.Linear-style init: U(-1/sqrt(fan_in), 1/sqrt(fan_in))."""
    k1, k2, k3, k4 = jax.random.split(key, 4)
    bound1 = 1.0 / (IN_FEATURES ** 0.5)
    bound2 = 1.0 / (HIDDEN ** 0.5)
    w1 = jax.random.uniform(k1, (HIDDEN, IN_FEATURES), jnp.float32,
                            minval=-bound1, maxval=bound1)
    b1 = jax.random.uniform(k2, (HIDDEN,), jnp.float32,
                            minval=-bound1, maxval=bound1)
    w2 = jax.random.uniform(k3, (HIDDEN,), jnp.float32,
                            minval=-bound2, maxval=bound2)
    b2 = jax.random.uniform(k4, (OUT_FEATURES,), jnp.float32,
                            minval=-bound2, maxval=bound2)
    return w1, b1, w2, b2


def _reference(x, w1, b1, w2, b2):
    h = jnp.maximum(x @ w1.T + b1, 0.0)
    return h @ w2.reshape(HIDDEN, OUT_FEATURES) + b2


if __name__ == "__main__":
    key = jax.random.PRNGKey(0)
    kx, kp, kx2 = jax.random.split(key, 3)
    w1, b1, w2, b2 = init_params(kp)

    # Small check (single clipped tile, batch < 128 pad path).
    batch = 8
    x = jax.random.normal(kx, (batch, IN_FEATURES), jnp.float32)
    y = jax.block_until_ready(nonlinear_forward(x, w1, b1, w2, b2))
    y_ref = _reference(x, w1, b1, w2, b2)
    assert y.shape == (batch, OUT_FEATURES)
    assert jnp.allclose(y, y_ref, atol=1e-5, rtol=1e-5)

    # Multi-tile check with a ragged final block (grid + edge clipping, no pad).
    batch2 = 2500
    x2 = jax.random.normal(kx2, (batch2, IN_FEATURES), jnp.float32)
    y2 = jax.block_until_ready(
        nonlinear_forward(x2, w1, b1, w2, b2, block_b=1024))
    y2_ref = _reference(x2, w1, b1, w2, b2)
    assert y2.shape == (batch2, OUT_FEATURES)
    assert jnp.allclose(y2, y2_ref, atol=1e-5, rtol=1e-5)

    # Feature-major fast path (no wrapper relayout; default adaptive tile,
    # forced 2-step grid so both v7x TensorCores get work).
    y3 = jax.block_until_ready(
        nonlinear_forward_feature_major(jnp.transpose(x2), w1, b1, w2, b2))
    assert y3.shape == (1, batch2)
    assert jnp.allclose(y3[0], y2_ref[:, 0], atol=1e-5, rtol=1e-5)

    print("KERNEL_OK")
</pallas_src>

<mosaic_0001>
module attributes {stable_mosaic.version = 11 : i64} {
  func.func @_mlp_kernel(%arg0: i32, %arg1: memref<13x128xf32, #tpu.memory_space<vmem>>, %arg2: memref<10x13xf32, #tpu.memory_space<vmem>>, %arg3: memref<10x1xf32, #tpu.memory_space<vmem>>, %arg4: memref<10x1xf32, #tpu.memory_space<vmem>>, %arg5: memref<1x1xf32, #tpu.memory_space<vmem>>, %arg6: memref<1x128xf32, #tpu.memory_space<vmem>>) attributes {dimension_semantics = [#tpu.dimension_semantics<parallel>], iteration_bounds = array<i64: 1>, scalar_prefetch = 0 : i64, scratch_operands = 0 : i64, tpu.core_type = #tpu.core_type<tc>, window_params = [{transform_indices = @transform_0, window_bounds = array<i64: 13, 128>}, {pipeline_mode = #tpu.pipeline_mode<synchronous>, transform_indices = @transform_1, window_bounds = array<i64: 10, 13>}, {pipeline_mode = #tpu.pipeline_mode<synchronous>, transform_indices = @transform_2, window_bounds = array<i64: 10, 1>}, {pipeline_mode = #tpu.pipeline_mode<synchronous>, transform_indices = @transform_3, window_bounds = array<i64: 10, 1>}, {pipeline_mode = #tpu.pipeline_mode<synchronous>, transform_indices = @transform_4, window_bounds = array<i64: 1, 1>}, {transform_indices = @transform_5, window_bounds = array<i64: 1, 128>}]} {
    %c0 = arith.constant 0 : index
    %c0_0 = arith.constant 0 : index
    %0 = vector.load %arg1[%c0, %c0_0] : memref<13x128xf32, #tpu.memory_space<vmem>>, vector<13x128xf32>
    %c0_1 = arith.constant 0 : index
    %c0_2 = arith.constant 0 : index
    %1 = vector.load %arg2[%c0_1, %c0_2] : memref<10x13xf32, #tpu.memory_space<vmem>>, vector<10x13xf32>
    %cst = arith.constant dense<0.000000e+00> : vector<10x128xf32>
    %2 = tpu.matmul %1, %0, %cst {dimension_numbers = #tpu.dot_dimension_numbers<[1], [0], [0], [1], [0, 0, 1, 1], [], []>} : vector<10x13xf32>, vector<13x128xf32>, vector<10x128xf32> -> vector<10x128xf32>
    %c0_3 = arith.constant 0 : index
    %c0_4 = arith.constant 0 : index
    %3 = vector.load %arg3[%c0_3, %c0_4] : memref<10x1xf32, #tpu.memory_space<vmem>>, vector<10x1xf32>
    %4 = vector.broadcast %3 : vector<10x1xf32> to vector<10x128xf32>
    %5 = arith.addf %2, %4 : vector<10x128xf32>
    %cst_5 = arith.constant 0.000000e+00 : f32
    %6 = vector.broadcast %cst_5 : f32 to vector<10x128xf32>
    %7 = arith.maximumf %5, %6 : vector<10x128xf32>
    %c0_6 = arith.constant 0 : index
    %c0_7 = arith.constant 0 : index
    %8 = vector.load %arg4[%c0_6, %c0_7] : memref<10x1xf32, #tpu.memory_space<vmem>>, vector<10x1xf32>
    %9 = vector.broadcast %8 : vector<10x1xf32> to vector<10x128xf32>
    %10 = arith.mulf %7, %9 : vector<10x128xf32>
    %cst_8 = arith.constant dense<0.000000e+00> : vector<128xf32>
    %11 = vector.multi_reduction <add>, %10, %cst_8 [0] : vector<10x128xf32> to vector<128xf32>
    %12 = vector.shape_cast %11 : vector<128xf32> to vector<1x128xf32>
    %c0_9 = arith.constant 0 : index
    %c0_10 = arith.constant 0 : index
    %13 = vector.load %arg5[%c0_9, %c0_10] : memref<1x1xf32, #tpu.memory_space<vmem>>, vector<1x1xf32>
    %14 = vector.broadcast %13 : vector<1x1xf32> to vector<1x128xf32>
    %15 = arith.addf %12, %14 : vector<1x128xf32>
    %c0_11 = arith.constant 0 : index
    %c0_12 = arith.constant 0 : index
    %16 = vector.load %arg6[%c0_11, %c0_12] : memref<1x128xf32, #tpu.memory_space<vmem>>, vector<1x128xf32>
    tpu.vector_store %arg6[%c0_11, %c0_12], %15 {strides = array<i32>} : memref<1x128xf32, #tpu.memory_space<vmem>>, vector<1x128xf32>,
    return
  }
  func.func @transform_0(%arg0: i32) -> (i32, i32) {
    %c0_i32 = arith.constant 0 : i32
    %c0_i32_0 = arith.constant 0 : i32
    return %c0_i32, %arg0 : i32, i32
  }
  func.func @transform_1(%arg0: i32) -> (i32, i32) {
    %c0_i32 = arith.constant 0 : i32
    %c0_i32_0 = arith.constant 0 : i32
    %c0_i32_1 = arith.constant 0 : i32
    return %c0_i32, %c0_i32_0 : i32, i32
  }
  func.func @transform_2(%arg0: i32) -> (i32, i32) {
    %c0_i32 = arith.constant 0 : i32
    %c0_i32_0 = arith.constant 0 : i32
    %c0_i32_1 = arith.constant 0 : i32
    return %c0_i32, %c0_i32_0 : i32, i32
  }
  func.func @transform_3(%arg0: i32) -> (i32, i32) {
    %c0_i32 = arith.constant 0 : i32
    %c0_i32_0 = arith.constant 0 : i32
    %c0_i32_1 = arith.constant 0 : i32
    return %c0_i32, %c0_i32_0 : i32, i32
  }
  func.func @transform_4(%arg0: i32) -> (i32, i32) {
    %c0_i32 = arith.constant 0 : i32
    %c0_i32_0 = arith.constant 0 : i32
    %c0_i32_1 = arith.constant 0 : i32
    return %c0_i32, %c0_i32_0 : i32, i32
  }
  func.func @transform_5(%arg0: i32) -> (i32, i32) {
    %c0_i32 = arith.constant 0 : i32
    %c0_i32_0 = arith.constant 0 : i32
    return %c0_i32, %arg0 : i32, i32
  }
}

</mosaic_0001>

<bundles_post_ra>
// kernel: nonlinear_forward.1
= control target key start
LH: loop header
LB: loop body
LE: loop exit
PB: predicated region body
PF: predicated region fallthrough
CT: control target
= control target key end

     0   :  { %vm45_vm0 = vcmask 1044480   ;;  %vm38_vm1 = vcmask 105472   ;;  %v182_v3 = vmov 0   ;;  %vm140_vm2 = vcmask 1041408   ;;  %s247_s0 = inlined_call_operand.vmem [shape: f32[13,128], index: 0, kind: input, shape index: {}]   ;;  %s248_s1 = inlined_call_operand.vmem [shape: f32[10,13], index: 1, kind: input, shape index: {}]   ;;  %s249_s2 = inlined_call_operand.vmem [shape: f32[10,1], index: 2, kind: input, shape index: {}]   ;;  %s250_s3 = inlined_call_operand.vmem [shape: f32[10,1], index: 3, kind: input, shape index: {}]   ;;  %s251_s4 = inlined_call_operand.<no memory space> [shape: f32[1,1], index: 4, kind: input, shape index: {}]   ;;  %s252_s5 = inlined_call_operand.vmem [shape: f32[1,128], index: 5, kind: output, shape index: {}]  }
   0x1   :  { %v23_v0 = vld [vmem:[%s247_s0 + $0x8] sm:$0x1f]  ;;  %v22_v1 = vld [vmem:[%s247_s0] sm:$0xff]  ;;  %180 = vset.pattern.permute.xlu0 %v182_v3  ;;  %181 = vset.pattern.permute.xlu1 %v182_v3  ;;  %v10_v4 = vstv %s251_s4  ;;  %v155_v24 = vlaneseq }
   0x2   :  { %v24_v2 = vld [vmem:[%s248_s1] sm:$0xff]  ;;  %172 = vmatprep.subr.msk.mxu0 %vm45_vm0, %v23_v0  ;;  %v27_v5 = vld [vmem:[%s249_s2 + $0x8] sm:$0x3]  ;;  %11 = vst [vmem:[#allocation2] sm:$0x1] %v10_v4 }
   0x3   :  { %176 = vmatprep.mubr.msk.f32.mxu0 %vm38_vm1, %v24_v2  ;;  %173 = vmatpush3.msk.msra.mxu0 %vm45_vm0, %v23_v0  ;;  %v25_v6 = vld [vmem:[%s248_s1 + $0x8] sm:$0x3]  ;;  %v26_v8 = vld [vmem:[%s249_s2] sm:$0xff]  ;;  %v156_v27 = vshrl.u32 %v155_v24, 7 }
   0x4   :  { %35 = vperm.xlu0 %180, %v27_v5   ;;  %v127_v7 = vld [vmem:[%s250_s3 + $0x8] sm:$0x3]  ;;  %174 = vmatprep.subr.mxu0 %v22_v1  ;;  %v126_v9 = vld [vmem:[%s250_s3] sm:$0xff] }
   0x5   :  { %135 = vperm.xlu1 %181, %v127_v7   ;;  %175 = vmatpush3.msra.mxu0 %v22_v1  ;;  %v157_v30 = vsub.s32 0, %v156_v27 }
   0x6   :  { %177 = vmatmul.mubr.msk.f32.vlgmr.msra.gmra.mxu0 %vm38_vm1, %v25_v6 }
   0x8   :  { %30 = vperm.xlu0 %180, %v26_v8  }
   0x9   :  { %130 = vperm.xlu1 %181, %v126_v9   ;;  %v149_v10 = vld [vmem:[#allocation2] sm:$0x1] }
   0xc   :  { %152 = vperm.xlu0 %180, %v149_v10  }
  0x7f   :  { %v36_v11 = vpop.permute.xlu0 %35 }
  0x80   :  { %v136_v12 = vpop.permute.xlu1 %135 }
  0x83   :  { %v31_v15 = vpop.permute.xlu0 %30 }
  0x84   :  { %v131_v21 = vpop.permute.xlu1 %130 }
  0x87   :  { %v153_v32 = vpop.permute.xlu0 %152 }
  0x88   :  { %v158_v34 = vrot.slane %v153_v32, %v157_v30 }
  0xc6   :  { %v178_v13 = vpop.f32.mrf.mxu0 }
  0xc7   :  { %v121_v14 = vadd.f32 %v178_v13, %v36_v11 }
  0xc8   :  { %v115_v16 = vpop.f32.mrf.mxu0 }
  0xc9   :  { %v125_v17 = vmax.f32 %v121_v14, 0.0  ;;  %v116_v18 = vadd.f32 %v115_v16, %v31_v15 }
  0xcb   :  { %v139_v19 = vmul.f32 %v136_v12, %v125_v17  ;;  %v124_v20 = vmax.f32 %v116_v18, 0.0 }
  0xcd   :  { %v141_v22 = vsel %vm140_vm2, %v139_v19, 0.0  ;;  %v138_v23 = vmul.f32 %v131_v21, %v124_v20 }
  0xcf   :  { %v142_v25 = vadd.f32 %v141_v22, %v138_v23 }
  0xd1   :  { %v143_v26 = vrot.slane %v142_v25, 4 }
  0xd3   :  { %v144_v28 = vadd.f32 %v143_v26, %v142_v25 }
  0xd5   :  { %v145_v29 = vrot.slane %v144_v28, 2 }
  0xd7   :  { %v146_v31 = vadd.f32 %v145_v29, %v144_v28 }
  0xd9   :  { %v147_v33 = vrot.slane %v146_v31, 1 }
  0xdb   :  { %v148_v35 = vadd.f32 %v147_v33, %v146_v31 }
  0xdd   :  { %v159_v36 = vadd.f32 %v158_v34, %v148_v35 }
  0xdf   :  { %160 = vst [vmem:[%s252_s5] sm:$0x1] %v159_v36 }

</bundles_post_ra>
